<compile_context>
chip_gen: v7x
topology: tpu7x:2x2x1
jax: 0.10.0
libtpu: 0.0.40
codegen_flags: <defaults>
</compile_context>

<pallas_src>
import jax
import jax.numpy as jnp
from jax import lax
from jax.experimental import pallas as pl
from jax.experimental.pallas import tpu as pltpu


def _round_up(x, m):
    return ((x + m - 1) // m) * m


def _cdiv(a, b):
    return (a + b - 1) // b


# --------------------------- kernel bodies ---------------------------

def _linear_kernel_single_k(x_ref, w_ref, b_ref, o_ref):
    # Whole K in one tile: one MXU dot, bias add in f32, single final cast.
    # No scratch accumulator, no per-K RMW of the (tm, tn) tile.
    acc = lax.dot_general(
        x_ref[...], w_ref[...],
        dimension_numbers=(((1,), (1,)), ((), ())),   # contract x dim1 w dim1 == x @ W.T
        preferred_element_type=jnp.float32)
    o_ref[...] = (acc + b_ref[...].astype(jnp.float32)).astype(o_ref.dtype)


def _linear_kernel_multi_k(x_ref, w_ref, b_ref, o_ref, acc_ref):
    # K split over grid axis 2 (innermost, "arbitrary"); f32 VMEM accumulator.
    k = pl.program_id(2)

    @pl.when(k == 0)
    def _():
        # Bias-initialized accumulator: removes the epilogue add.
        acc_ref[...] = jnp.broadcast_to(
            b_ref[...].astype(jnp.float32), acc_ref.shape)

    acc_ref[...] += lax.dot_general(
        x_ref[...], w_ref[...],
        dimension_numbers=(((1,), (1,)), ((), ())),
        preferred_element_type=jnp.float32)

    @pl.when(k == pl.num_programs(2) - 1)
    def _():
        o_ref[...] = acc_ref[...].astype(o_ref.dtype)


# --------------------------- wrapper API ---------------------------

def prepare_linear_params(weight, bias, *, compute_dtype=None,
                          tn_max=512, tk_max=2048):
    """One-time parameter preparation (pad / cast), hoisted out of the per-call path.

    weight: (D_out, D_in)  PyTorch layout, consumed as-is (no transpose).
    bias:   (D_out,)
    compute_dtype: e.g. jnp.bfloat16 on v6e/v7x (f32 accumulate kept in-kernel).
    """
    D_out, D_in = weight.shape
    assert bias.shape == (D_out,)
    if compute_dtype is None:
        compute_dtype = weight.dtype
    compute_dtype = jnp.dtype(compute_dtype)

    # Lane-align, then round to tile multiples so tiles always divide evenly.
    Np = _round_up(D_out, 128)
    Kp = _round_up(D_in, 128)
    tn = min(tn_max, Np)
    tk = Kp if Kp <= tk_max else tk_max
    Np = _round_up(Np, tn)
    Kp = _round_up(Kp, tk)

    w = jnp.pad(weight, ((0, Np - D_out), (0, Kp - D_in))).astype(compute_dtype)
    b2 = jnp.pad(bias.astype(jnp.float32), (0, Np - D_out)).reshape(1, Np)

    return {"w": w, "b2": b2, "D_in": D_in, "D_out": D_out,
            "tn": tn, "tk": tk, "compute_dtype": compute_dtype}


def linear_forward(x, params, *, tm_max=512):
    """y = x @ weight.T + bias (torch.nn.Linear), with params from prepare_linear_params."""
    B, D_in = x.shape
    assert D_in == params["D_in"], "weight inner dim must match x inner dim"
    D_out = params["D_out"]
    w, b2 = params["w"], params["b2"]
    Np, Kp = w.shape
    tn, tk = params["tn"], params["tk"]
    compute_dtype = params["compute_dtype"]
    out_dtype = x.dtype                      # output matches caller's activation dtype

    # Sublane alignment: 8 for 32-bit, 16 for 16-bit packed dtypes.
    sub = 8 if compute_dtype.itemsize >= 4 else 16

    # Divisor-aware tm: never pad B up to a full max tile; if the whole (padded)
    # batch fits one tile, the weight is streamed from HBM exactly once.
    n_m = _cdiv(B, tm_max)
    tm = _round_up(_cdiv(B, n_m), sub)
    Bp = tm * n_m
    grid_m = Bp // tm
    grid_k = Kp // tk

    # Keep >= 2 blocks on a "parallel" axis (v7x megacore) when M collapsed to 1.
    if grid_m == 1 and (Np // tn) < 2 and tn >= 256:
        tn = tn // 2 if (tn // 2) % 128 == 0 else 128
    grid_n = Np // tn

    # Per-call activation padding only (K-pad contributes 0 to the dot).
    if (Bp, Kp) != (B, D_in):
        x = jnp.pad(x, ((0, Bp - B), (0, Kp - D_in)))
    if x.dtype != compute_dtype:
        x = x.astype(compute_dtype)

    # Per-operand VMEM footprint (double-buffered in/out tiles + accumulator),
    # clamped generation-aware (v7x: 64 MiB physical, 32 MiB default scoped).
    in_elt = compute_dtype.itemsize
    out_elt = jnp.dtype(out_dtype).itemsize
    tile_bytes = (2 * in_elt * tm * tk        # x tile (double buffered)
                  + 2 * in_elt * tn * tk      # weight tile (double buffered)
                  + 2 * 4 * tn                # bias tile (f32)
                  + 2 * out_elt * tm * tn)    # output tile (double buffered)
    if grid_k > 1:
        tile_bytes += 4 * tm * tn             # f32 accumulator scratch
    try:
        vmem_cap = int(pltpu.get_tpu_info().vmem_capacity_bytes)
    except Exception:
        vmem_cap = 64 * 1024 * 1024
    vmem_limit = int(min(max(2 * tile_bytes, 16 * 1024 * 1024), vmem_cap // 2))

    if grid_k == 1:
        kernel = _linear_kernel_single_k
        grid = (grid_m, grid_n)
        in_specs = [
            pl.BlockSpec((tm, tk), lambda i, j: (i, 0)),   # x tile
            pl.BlockSpec((tn, tk), lambda i, j: (j, 0)),   # weight tile (PyTorch layout)
            pl.BlockSpec((1, tn), lambda i, j: (0, j)),    # bias tile
        ]
        out_spec = pl.BlockSpec((tm, tn), lambda i, j: (i, j))
        scratch = []
        dims = ("parallel", "parallel")
    else:
        kernel = _linear_kernel_multi_k
        grid = (grid_m, grid_n, grid_k)
        in_specs = [
            pl.BlockSpec((tm, tk), lambda i, j, k: (i, k)),
            pl.BlockSpec((tn, tk), lambda i, j, k: (j, k)),
            pl.BlockSpec((1, tn), lambda i, j, k: (0, j)),
        ]
        out_spec = pl.BlockSpec((tm, tn), lambda i, j, k: (i, j))
        scratch = [pltpu.VMEM((tm, tn), jnp.float32)]
        dims = ("parallel", "parallel", "arbitrary")

    out_padded = pl.pallas_call(
        kernel,
        out_shape=jax.ShapeDtypeStruct((Bp, Np), out_dtype),
        grid_spec=pltpu.PrefetchScalarGridSpec(
            num_scalar_prefetch=0,
            grid=grid,
            in_specs=in_specs,
            out_specs=out_spec,
            scratch_shapes=scratch,
        ),
        compiler_params=pltpu.CompilerParams(
            dimension_semantics=dims,
            vmem_limit_bytes=vmem_limit,
        ),
    )(x, w, b2)

    return out_padded[:B, :D_out]


if __name__ == "__main__":
    # Small shapes consistent with the module: batch=8, input_dim=32, output_dim=16.
    # (At this size the kernel is overhead-dominated; the tiling logic above is
    #  what matters for production-sized B / D_in / D_out.)
    batch, input_dim, output_dim = 8, 32, 16

    key = jax.random.PRNGKey(0)
    kx, kw, kb = jax.random.split(key, 3)

    x = jax.random.normal(kx, (batch, input_dim), dtype=jnp.float32)
    # Deterministic parameter init (mimics torch.nn.Linear uniform init range).
    bound = 1.0 / (input_dim ** 0.5)
    weight = jax.random.uniform(
        kw, (output_dim, input_dim), minval=-bound, maxval=bound, dtype=jnp.float32)
    bias = jax.random.uniform(
        kb, (output_dim,), minval=-bound, maxval=bound, dtype=jnp.float32)

    # One-time parameter prep (padding / casting hoisted out of the per-call path).
    # For bf16 MXU on v6e/v7x pass compute_dtype=jnp.bfloat16; demo keeps f32.
    params = prepare_linear_params(weight, bias)

    fwd = jax.jit(lambda xx: linear_forward(xx, params))
    y = fwd(x)
    jax.block_until_ready(y)

    # Correctness check against plain JAX reference.
    y_ref = x @ weight.T + bias
    assert y.shape == (batch, output_dim)
    assert jnp.allclose(y, y_ref, atol=1e-5, rtol=1e-5)

    print("KERNEL_OK")
</pallas_src>

<mosaic_0001>
module attributes {stable_mosaic.version = 11 : i64} {
  func.func @_linear_kernel_single_k(%arg0: i32, %arg1: i32, %arg2: memref<8x128xf32, #tpu.memory_space<vmem>>, %arg3: memref<128x128xf32, #tpu.memory_space<vmem>>, %arg4: memref<1x128xf32, #tpu.memory_space<vmem>>, %arg5: memref<8x128xf32, #tpu.memory_space<vmem>>) attributes {dimension_semantics = [#tpu.dimension_semantics<parallel>, #tpu.dimension_semantics<parallel>], iteration_bounds = array<i64: 1, 1>, scalar_prefetch = 0 : i64, scratch_operands = 0 : i64, tpu.core_type = #tpu.core_type<tc>, window_params = [{transform_indices = @transform_0, window_bounds = array<i64: 8, 128>}, {transform_indices = @transform_1, window_bounds = array<i64: 128, 128>}, {transform_indices = @transform_2, window_bounds = array<i64: 1, 128>}, {transform_indices = @transform_3, window_bounds = array<i64: 8, 128>}]} {
    %c0 = arith.constant 0 : index
    %c0_0 = arith.constant 0 : index
    %0 = vector.load %arg2[%c0, %c0_0] : memref<8x128xf32, #tpu.memory_space<vmem>>, vector<8x128xf32>
    %c0_1 = arith.constant 0 : index
    %c0_2 = arith.constant 0 : index
    %1 = vector.load %arg3[%c0_1, %c0_2] : memref<128x128xf32, #tpu.memory_space<vmem>>, vector<128x128xf32>
    %cst = arith.constant dense<0.000000e+00> : vector<8x128xf32>
    %2 = tpu.matmul %0, %1, %cst {dimension_numbers = #tpu.dot_dimension_numbers<[1], [1], [0], [0], [0, 0, 1, 0], [], []>} : vector<8x128xf32>, vector<128x128xf32>, vector<8x128xf32> -> vector<8x128xf32>
    %c0_3 = arith.constant 0 : index
    %c0_4 = arith.constant 0 : index
    %3 = vector.load %arg4[%c0_3, %c0_4] : memref<1x128xf32, #tpu.memory_space<vmem>>, vector<1x128xf32>
    %4 = vector.broadcast %3 : vector<1x128xf32> to vector<8x128xf32>
    %5 = arith.addf %2, %4 : vector<8x128xf32>
    %c0_5 = arith.constant 0 : index
    %c0_6 = arith.constant 0 : index
    %6 = vector.load %arg5[%c0_5, %c0_6] : memref<8x128xf32, #tpu.memory_space<vmem>>, vector<8x128xf32>
    tpu.vector_store %arg5[%c0_5, %c0_6], %5 {strides = array<i32>} : memref<8x128xf32, #tpu.memory_space<vmem>>, vector<8x128xf32>,
    return
  }
  func.func @transform_0(%arg0: i32, %arg1: i32) -> (i32, i32) {
    %c0_i32 = arith.constant 0 : i32
    %c0_i32_0 = arith.constant 0 : i32
    return %arg0, %c0_i32 : i32, i32
  }
  func.func @transform_1(%arg0: i32, %arg1: i32) -> (i32, i32) {
    %c0_i32 = arith.constant 0 : i32
    %c0_i32_0 = arith.constant 0 : i32
    return %arg1, %c0_i32 : i32, i32
  }
  func.func @transform_2(%arg0: i32, %arg1: i32) -> (i32, i32) {
    %c0_i32 = arith.constant 0 : i32
    %c0_i32_0 = arith.constant 0 : i32
    return %c0_i32, %arg1 : i32, i32
  }
  func.func @transform_3(%arg0: i32, %arg1: i32) -> (i32, i32) {
    %c0_i32 = arith.constant 0 : i32
    return %arg0, %arg1 : i32, i32
  }
}

</mosaic_0001>

<bundles_post_ra>
// kernel: _lambda_.1
= control target key start
LH: loop header
LB: loop body
LE: loop exit
PB: predicated region body
PF: predicated region fallthrough
CT: control target
= control target key end

     0   :  { %8 = vsyncpa [#allocation3], 0  ;;  %s328_s0 = inlined_call_operand.vmem [shape: f32[8,128], index: 0, kind: input, shape index: {}]   ;;  %s329_s1 = inlined_call_operand.hbm [shape: f32[128,128], index: 1, kind: input, shape index: {}]   ;;  %s330_s2 = inlined_call_operand.vmem [shape: f32[1,128], index: 2, kind: input, shape index: {}]   ;;  %s331_s3 = inlined_call_operand.hbm [shape: f32[8,128], index: 3, kind: output, shape index: {}]  }
   0x1   :  { %9 = vsyncpa [#allocation4], 0  ;;  %s271_s12 = smov [#allocation2]   ;;  %s223_s16 = scalar_lea.hbm %s329_s1, 2048 }
   0x2   :  { %s17_s13 = sshll.u32 %s271_s12, 4  ;;  %p224_p0 = scmp.ne.s32.totalorder %s329_s1, %s223_s16  ;;  %s18_s13 = int_to_ptr.vmem [resolvable:$true] %s17_s13 }
   0x3   :  { %p227_p1 = scmp.lt.u32.totalorder %s223_s16, %s329_s1 }
   0x5   :  { %p229_p2 = pnand %p227_p1, %p224_p0 }
   0x7   :  { %232 = shalt.err (!%p229_p2)
}
   0x8   :  { %s233_s21 = scalar_lea.vmem %s18_s13, 2048  ;;  %p238_p4 = scmp.lt.s32.totalorder %s18_s13, %s18_s13 }
   0x9   :  { %p234_p3 = scmp.ne.s32.totalorder %s18_s13, %s233_s21  ;;  %p239_p5 = scmp.lt.s32.totalorder %s233_s21, %s233_s21 }
   0xb   :  { %p240_p6 = por %p239_p5, %p238_p4 }
   0xd   :  { %p241_p7 = pnand %p240_p6, %p234_p3 }
   0xf   :  { %244 = shalt.err (!%p241_p7)
}
  0x10   :  { %s272_s22 = smov 128   ;;  %s273_s23 = smov 8  }
  0x11   :  { %23 = dma.hbm_to_vmem [thread:$0]  %s329_s1, 2048, %s18_s13, [#allocation3], %s272_s22, %s272_s22, %s273_s23  }
  0x12   :  { %267 = dma.done.wait [#allocation3], 2048  }
  0x13   :  { %268 = vsyncadd [#allocation3], 4294965248  ;;  %v274_v0 = vmov 0.0|0.0   ;;  %vm275_vm0 = vmmov 0   ;;  %v276_v1 = vmov 0.0   ;;  %v30_v2 = vld [vmem:[#allocation2] sm:$0xff] }
  0x14   :  { %192 = vmatprep.subr.bf16.mxu0 %v274_v0  ;;  %189 = vmatprep.mubr.msk.f32.mxu0 %vm275_vm0, %v276_v1  ;;  %v31_v3 = vld [vmem:[#allocation2 + $0x8] sm:$0xff]  ;;  %v32_v5 = vld [vmem:[#allocation2 + $0x10] sm:$0xff]  ;;  %v33_v6 = vld [vmem:[#allocation2 + $0x18] sm:$0xff]  ;;  %s277_s29 = smov [#allocation5]  }
  0x15   :  { %v193_v4 = vpack.c.bf16 %v31_v3, %v30_v2  ;;  %v196_v7 = vpack.c.bf16 %v33_v6, %v32_v5  ;;  %v34_v8 = vld [vmem:[#allocation2 + $0x20] sm:$0xff]  ;;  %v35_v9 = vld [vmem:[#allocation2 + $0x28] sm:$0xff]  ;;  %v36_v11 = vld [vmem:[#allocation2 + $0x30] sm:$0xff]  ;;  %s130_s30 = sshll.u32 %s277_s29, 4  ;;  %s131_s30 = int_to_ptr.vmem [resolvable:$true] %s130_s30 }
  0x16   :  { %v199_v10 = vpack.c.bf16 %v35_v9, %v34_v8  ;;  %v37_v12 = vld [vmem:[#allocation2 + $0x38] sm:$0xff]  ;;  %v38_v14 = vld [vmem:[#allocation2 + $0x40] sm:$0xff]  ;;  %v39_v15 = vld [vmem:[#allocation2 + $0x48] sm:$0xff]  ;;  %s245_s4 = scalar_lea.vmem %s131_s30, 128  ;;  %p250_p9 = scmp.lt.s32.totalorder %s131_s30, %s131_s30 }
  0x17   :  { %194 = vmatpush3.bf16.xpose.msra.mxu0 %v193_v4  ;;  %v202_v13 = vpack.c.bf16 %v37_v12, %v36_v11  ;;  %v205_v16 = vpack.c.bf16 %v39_v15, %v38_v14  ;;  %v40_v17 = vld [vmem:[#allocation2 + $0x50] sm:$0xff]  ;;  %v41_v18 = vld [vmem:[#allocation2 + $0x58] sm:$0xff]  ;;  %v42_v20 = vld [vmem:[#allocation2 + $0x60] sm:$0xff]  ;;  %p246_p8 = scmp.ne.s32.totalorder %s131_s30, %s245_s4  ;;  %p251_p10 = scmp.lt.s32.totalorder %s245_s4, %s245_s4 }
  0x18   :  { %195 = vmatprep.subr.bf16.mxu0 %v274_v0  ;;  %v208_v19 = vpack.c.bf16 %v41_v18, %v40_v17  ;;  %v43_v21 = vld [vmem:[#allocation2 + $0x68] sm:$0xff]  ;;  %v44_v23 = vld [vmem:[#allocation2 + $0x70] sm:$0xff]  ;;  %v45_v24 = vld [vmem:[#allocation2 + $0x78] sm:$0xff] }
  0x19   :  { %v211_v22 = vpack.c.bf16 %v43_v21, %v42_v20  ;;  %v214_v25 = vpack.c.bf16 %v45_v24, %v44_v23  ;;  %v29_v26 = vld [vmem:[%s328_s0] sm:$0xff]  ;;  %p252_p11 = por %p251_p10, %p250_p9 }
  0x1a   :  { %v139_v27 = vld [vmem:[%s330_s2] ss:$0 sm:$0xff] }
  0x1b   :  { %p253_p12 = pnand %p252_p11, %p246_p8 }
  0x1f   :  { %197 = vmatpush3.bf16.xpose.msra.mxu0 %v196_v7 }
  0x20   :  { %198 = vmatprep.subr.bf16.mxu0 %v274_v0 }
  0x27   :  { %200 = vmatpush3.bf16.xpose.msra.mxu0 %v199_v10 }
  0x28   :  { %201 = vmatprep.subr.bf16.mxu0 %v274_v0 }
  0x2f   :  { %203 = vmatpush3.bf16.xpose.msra.mxu0 %v202_v13 }
  0x30   :  { %204 = vmatprep.subr.bf16.mxu0 %v274_v0 }
  0x37   :  { %206 = vmatpush3.bf16.xpose.msra.mxu0 %v205_v16 }
  0x38   :  { %207 = vmatprep.subr.bf16.mxu0 %v274_v0 }
  0x3f   :  { %209 = vmatpush3.bf16.xpose.msra.mxu0 %v208_v19 }
  0x40   :  { %210 = vmatprep.subr.bf16.mxu0 %v274_v0 }
  0x47   :  { %212 = vmatpush3.bf16.xpose.msra.mxu0 %v211_v22 }
  0x48   :  { %213 = vmatprep.subr.bf16.mxu0 %v274_v0 }
  0x4f   :  { %215 = vmatpush3.bf16.xpose.msra.mxu0 %v214_v25 }
  0x56   :  { %190 = vmatmul.mubr.f32.vlgmr.msra.gmra.mrb[0].mxu0 %v29_v26 }
 0x129   :  { %v119_v28 = vpop.f32.mrb[0].mxu0 }
 0x12a   :  { %v120_v29 = vadd.f32 %v139_v27, %v119_v28  ;;  %v191_v30 = vpop.f32.mrb[1].mxu0 }
 0x12c   :  { %123 = vst [vmem:[#allocation5] sm:$0xff] %v120_v29 }
 0x12d   :  { %256 = shalt.err (!%p253_p12)
}
 0x12e   :  { %s257_s6 = scalar_lea.hbm %s331_s3, 128 }
 0x12f   :  { %p258_p13 = scmp.ne.s32.totalorder %s331_s3, %s257_s6  ;;  %p261_p0 = scmp.lt.u32.totalorder %s257_s6, %s331_s3 }
 0x131   :  { %p263_p1 = pnand %p261_p0, %p258_p13 }
 0x133   :  { %266 = shalt.err (!%p263_p1)
}
 0x134   :  { %133 = dma.vmem_to_hbm [thread:$0]  %s131_s30, 128, %s331_s3, [#allocation4]  }
 0x135   :  { %269 = dma.done.wait [#allocation4], 128  }
 0x136   :  { %270 = vsyncadd [#allocation4], 4294967168 }
 0x137   :  { %137 = vsyncpa [#allocation3], 1 }
 0x138   :  { %138 = vsyncpa [#allocation4], 1 }

</bundles_post_ra>
